<compile_context>
chip_gen: v6e
topology: v6e:2x2x1
jax: 0.10.0
libtpu: 0.0.40
codegen_flags: <defaults>
</compile_context>

<pallas_src>
import jax
import jax.numpy as jnp
from jax import lax
from jax.experimental import pallas as pl
from jax.experimental.pallas import tpu as pltpu


def crossnet_kernel(x_ref, w_ref, b_ref, m_ref, o_ref):
    # x_ref / o_ref: (TR, W) lane-dense tile. W == 128 (packed: 128//D batch
    #   rows per packed row) or W == D (natural fallback layout).
    # w_ref / b_ref: (L, W) per-layer kernel / bias, pre-tiled across segments.
    # m_ref: (W, W) block-diagonal ones; (t @ M)[r, q] == the feature sum of
    #   the batch element owning lane q, broadcast back over its D lanes.
    x0 = x_ref[...].astype(jnp.float32)                 # (TR, W)
    m = m_ref[...]                                      # (W, W) f32
    xl = x0
    num_layers = w_ref.shape[0]                         # small & static
    for i in range(num_layers):
        w = w_ref[i:i + 1, :].astype(jnp.float32)       # (1, W), read per layer
        b = b_ref[i:i + 1, :].astype(jnp.float32)       # (1, W)
        # Per-batch-element dot product + segment broadcast in one MXU op,
        # hidden under the tile DMA (mem-bound kernel, MXU otherwise idle).
        s = jnp.dot(xl * w, m, preferred_element_type=jnp.float32,
                    precision=lax.Precision.HIGHEST)    # (TR, W)
        xl = x0 * s + b + xl                            # VPU, f32
    o_ref[...] = xl.astype(o_ref.dtype)


def _cdiv(a: int, b: int) -> int:
    return (a + b - 1) // b


def _round_up(a: int, m: int) -> int:
    return _cdiv(a, m) * m


def crossnet_forward(x, kernels, bias, *, target_block_bytes=2 << 20):
    """x: (B, D); kernels: (L, D); bias: (L, D) -> (B, D)."""
    B, D = x.shape
    L = kernels.shape[0]
    itemsize = jnp.dtype(x.dtype).itemsize

    # ---- layout: lane-dense packing when D divides 128 -----------------------
    packed = (D < 128) and (128 % D == 0) and ((B * D) % 128 == 0)
    if packed:
        W = 128
        rep = W // D
        R = (B * D) // W
        x2 = x.reshape(R, W)                     # row-major bitcast: no HBM copy
        w2 = jnp.tile(kernels, (1, rep))         # (L, 128), tiny
        b2 = jnp.tile(bias, (1, rep))            # (L, 128), tiny
    else:
        W, R = D, B
        x2, w2, b2 = x, kernels, bias
    seg = jnp.arange(W) // D
    m = (seg[:, None] == seg[None, :]).astype(jnp.float32)   # (W, W) block-diag ones

    # ---- tile sizing ----------------------------------------------------------
    row_bytes = W * itemsize
    tr = max(8, (target_block_bytes // row_bytes) // 8 * 8)  # ~2 MiB input blocks

    # VMEM budget: double-buffered in/out blocks + f32 temporaries (x0, xl, t, s).
    try:
        vmem_cap = int(pltpu.get_tpu_info().vmem_capacity_bytes)
    except Exception:
        vmem_cap = 64 << 20                      # v7x per-core size (smallest gen)
    per_row_vmem = W * (4 * itemsize + 24)
    budget = min(vmem_cap // 2, 24 << 20)
    tr = min(tr, max(8, (budget // per_row_vmem) // 8 * 8))

    # Dual-TC parts (v7x): keep >= 2 grid steps for a large single-block input.
    if R >= 2048 and tr >= R:
        tr = _round_up(_cdiv(R, 2), 8)
    if tr >= R:
        tr = R                                   # single block covering everything
    grid = (_cdiv(R, tr),)

    footprint = tr * per_row_vmem + 2 * (2 * L * W + W * W) * 4
    vmem_limit = int(min(64 << 20, max(32 << 20, 2 * footprint)))

    cost = pl.CostEstimate(
        flops=L * (2 * R * W * W + 4 * R * W),
        transcendentals=0,
        bytes_accessed=2 * B * D * itemsize + (2 * L * W + W * W) * 4,
    )

    out2 = pl.pallas_call(
        crossnet_kernel,
        out_shape=jax.ShapeDtypeStruct((R, W), x.dtype),
        grid_spec=pltpu.PrefetchScalarGridSpec(
            num_scalar_prefetch=0,
            grid=grid,
            in_specs=[
                pl.BlockSpec((tr, W), lambda i: (i, 0)),   # x tile (lane-dense)
                pl.BlockSpec((L, W), lambda i: (0, 0)),    # kernels (resident)
                pl.BlockSpec((L, W), lambda i: (0, 0)),    # bias (resident)
                pl.BlockSpec((W, W), lambda i: (0, 0)),    # segment-sum matrix
            ],
            out_specs=pl.BlockSpec((tr, W), lambda i: (i, 0)),
        ),
        compiler_params=pltpu.CompilerParams(
            dimension_semantics=("parallel",),
            vmem_limit_bytes=vmem_limit,
        ),
        cost_estimate=cost,
    )(x2, w2, b2, m)

    return out2.reshape(B, D) if packed else out2


def crossnet_reference(x, kernels, bias):
    """Pure-JAX reference mirroring the PyTorch forward (vector param)."""
    x0 = x[:, :, None]            # (B, D, 1)
    xl = x0
    L = kernels.shape[0]
    for i in range(L):
        w = kernels[i][:, None]   # (D, 1)
        xl_w = jnp.tensordot(xl, w, axes=([1], [0]))      # (B, 1, 1)
        dot_ = jnp.matmul(x0, xl_w)                       # (B, D, 1)
        xl = dot_ + bias[i][:, None] + xl
    return xl[:, :, 0]


if __name__ == "__main__":
    B, D, L = 16, 32, 2   # batch, in_features, layer_num

    key = jax.random.PRNGKey(0)
    kx, kw = jax.random.split(key)

    x = jax.random.normal(kx, (B, D), dtype=jnp.float32)

    # Deterministic parameter init matching nn.init.xavier_normal_ on (D, 1):
    # std = gain * sqrt(2 / (fan_in + fan_out)) = sqrt(2 / (D + 1))
    std = (2.0 / (D + 1)) ** 0.5
    kernels = jax.random.normal(kw, (L, D), dtype=jnp.float32) * std
    bias = jnp.zeros((L, D), dtype=jnp.float32)

    fwd = jax.jit(crossnet_forward)
    out = jax.block_until_ready(fwd(x, kernels, bias))

    ref = crossnet_reference(x, kernels, bias)
    assert out.shape == (B, D)
    assert jnp.allclose(out, ref, atol=1e-5, rtol=1e-5), "mismatch vs reference"

    print("KERNEL_OK")
</pallas_src>

<mosaic_0001>
module attributes {stable_mosaic.version = 11 : i64} {
  func.func @crossnet_kernel(%arg0: i32, %arg1: memref<4x128xf32, #tpu.memory_space<vmem>>, %arg2: memref<2x128xf32, #tpu.memory_space<vmem>>, %arg3: memref<2x128xf32, #tpu.memory_space<vmem>>, %arg4: memref<128x128xf32, #tpu.memory_space<vmem>>, %arg5: memref<4x128xf32, #tpu.memory_space<vmem>>) attributes {dimension_semantics = [#tpu.dimension_semantics<parallel>], iteration_bounds = array<i64: 1>, scalar_prefetch = 0 : i64, scratch_operands = 0 : i64, tpu.core_type = #tpu.core_type<tc>, window_params = [{transform_indices = @transform_0, window_bounds = array<i64: 4, 128>}, {pipeline_mode = #tpu.pipeline_mode<synchronous>, transform_indices = @transform_1, window_bounds = array<i64: 2, 128>}, {pipeline_mode = #tpu.pipeline_mode<synchronous>, transform_indices = @transform_2, window_bounds = array<i64: 2, 128>}, {pipeline_mode = #tpu.pipeline_mode<synchronous>, transform_indices = @transform_3, window_bounds = array<i64: 128, 128>}, {transform_indices = @transform_4, window_bounds = array<i64: 4, 128>}]} {
    %c0 = arith.constant 0 : index
    %c0_0 = arith.constant 0 : index
    %0 = vector.load %arg1[%c0, %c0_0] : memref<4x128xf32, #tpu.memory_space<vmem>>, vector<4x128xf32>
    %c0_1 = arith.constant 0 : index
    %c0_2 = arith.constant 0 : index
    %1 = vector.load %arg4[%c0_1, %c0_2] : memref<128x128xf32, #tpu.memory_space<vmem>>, vector<128x128xf32>
    %c0_3 = arith.constant 0 : index
    %c0_4 = arith.constant 0 : index
    %2 = vector.load %arg2[%c0_3, %c0_4] : memref<2x128xf32, #tpu.memory_space<vmem>>, vector<1x128xf32>
    %c0_5 = arith.constant 0 : index
    %c0_6 = arith.constant 0 : index
    %3 = vector.load %arg3[%c0_5, %c0_6] : memref<2x128xf32, #tpu.memory_space<vmem>>, vector<1x128xf32>
    %4 = vector.broadcast %2 : vector<1x128xf32> to vector<4x128xf32>
    %5 = arith.mulf %0, %4 : vector<4x128xf32>
    %cst = arith.constant dense<0.000000e+00> : vector<4x128xf32>
    %6 = tpu.matmul %5, %1, %cst {dimension_numbers = #tpu.dot_dimension_numbers<[1], [0], [0], [1], [0, 0, 1, 1], [], []>, precision = #tpu.contract_precision<fp32>} : vector<4x128xf32>, vector<128x128xf32>, vector<4x128xf32> -> vector<4x128xf32>
    %7 = arith.mulf %0, %6 : vector<4x128xf32>
    %8 = vector.broadcast %3 : vector<1x128xf32> to vector<4x128xf32>
    %9 = arith.addf %7, %8 : vector<4x128xf32>
    %10 = arith.addf %9, %0 : vector<4x128xf32>
    %c1 = arith.constant 1 : index
    %c0_7 = arith.constant 0 : index
    %11 = vector.load %arg2[%c1, %c0_7] : memref<2x128xf32, #tpu.memory_space<vmem>>, vector<1x128xf32>
    %c1_8 = arith.constant 1 : index
    %c0_9 = arith.constant 0 : index
    %12 = vector.load %arg3[%c1_8, %c0_9] : memref<2x128xf32, #tpu.memory_space<vmem>>, vector<1x128xf32>
    %13 = vector.broadcast %11 : vector<1x128xf32> to vector<4x128xf32>
    %14 = arith.mulf %10, %13 : vector<4x128xf32>
    %cst_10 = arith.constant dense<0.000000e+00> : vector<4x128xf32>
    %15 = tpu.matmul %14, %1, %cst_10 {dimension_numbers = #tpu.dot_dimension_numbers<[1], [0], [0], [1], [0, 0, 1, 1], [], []>, precision = #tpu.contract_precision<fp32>} : vector<4x128xf32>, vector<128x128xf32>, vector<4x128xf32> -> vector<4x128xf32>
    %16 = arith.mulf %0, %15 : vector<4x128xf32>
    %17 = vector.broadcast %12 : vector<1x128xf32> to vector<4x128xf32>
    %18 = arith.addf %16, %17 : vector<4x128xf32>
    %19 = arith.addf %18, %10 : vector<4x128xf32>
    %c0_11 = arith.constant 0 : index
    %c0_12 = arith.constant 0 : index
    %20 = vector.load %arg5[%c0_11, %c0_12] : memref<4x128xf32, #tpu.memory_space<vmem>>, vector<4x128xf32>
    tpu.vector_store %arg5[%c0_11, %c0_12], %19 {strides = array<i32>} : memref<4x128xf32, #tpu.memory_space<vmem>>, vector<4x128xf32>,
    return
  }
  func.func @transform_0(%arg0: i32) -> (i32, i32) {
    %c0_i32 = arith.constant 0 : i32
    %c0_i32_0 = arith.constant 0 : i32
    return %arg0, %c0_i32 : i32, i32
  }
  func.func @transform_1(%arg0: i32) -> (i32, i32) {
    %c0_i32 = arith.constant 0 : i32
    %c0_i32_0 = arith.constant 0 : i32
    %c0_i32_1 = arith.constant 0 : i32
    return %c0_i32, %c0_i32_0 : i32, i32
  }
  func.func @transform_2(%arg0: i32) -> (i32, i32) {
    %c0_i32 = arith.constant 0 : i32
    %c0_i32_0 = arith.constant 0 : i32
    %c0_i32_1 = arith.constant 0 : i32
    return %c0_i32, %c0_i32_0 : i32, i32
  }
  func.func @transform_3(%arg0: i32) -> (i32, i32) {
    %c0_i32 = arith.constant 0 : i32
    %c0_i32_0 = arith.constant 0 : i32
    %c0_i32_1 = arith.constant 0 : i32
    return %c0_i32, %c0_i32_0 : i32, i32
  }
  func.func @transform_4(%arg0: i32) -> (i32, i32) {
    %c0_i32 = arith.constant 0 : i32
    %c0_i32_0 = arith.constant 0 : i32
    return %arg0, %c0_i32 : i32, i32
  }
}

</mosaic_0001>

<bundles_post_ra>
// kernel: tile.14
= control target key start
LH: loop header
LB: loop body
LE: loop exit
PB: predicated region body
PF: predicated region fallthrough
CT: control target
= control target key end

     0   :  { %s30_s10 = smov 3  ;;  %s11_s11 = smov 3  ;;  %vm13_vm0 = vcmask 261120   ;;  %vm20_vm1 = vcmask 1048320   ;;  %vm27_vm2 = vcmask 785920   ;;  %vm34_vm3 = vcmask 523520   ;;  %s70_s0 = inlined_call_operand.vmem [shape: f32[2,4,32], index: 0, kind: input, shape index: {}]   ;;  %s71_s1 = inlined_call_operand.vmem [shape: f32[2,128], index: 1, kind: output, shape index: {}]  }
   0x1   :  { %v44_v0 = vld [vmem:[%s70_s0 + $0x4] sm:$0xf]  ;;  %v9_v1 = vld [vmem:[%s70_s0] sm:$0xf]  ;;  %s16_s0 = smov 3  ;;  %s23_s12 = smov 3 }
   0x2   :  { %8 = vst [vmem:[#allocation1 + $0x8] sm:$0xf] %v44_v0  ;;  %10 = vst [vmem:[#allocation1] sm:$0xf] %v9_v1  ;;  %s48_s13 = smov 96   ;;  %s49_s14 = smov 32  }
   0x3   :  { %s50_s15 = smov 64  }
   0x9   :  { %v17_v2 = vld [vmem:[#allocation1 + $0x3] ss:$8 sm:%s16_s0]   ;;  %v31_v3 = vld [vmem:[#allocation1 + $0x1] ss:$8 sm:%s30_s10]   ;;  %v12_v4 = vld [vmem:[#allocation1] ss:$8 sm:%s11_s11]  }
   0xa   :  { %18 = vrot.lane.b32.xlu0 %v17_v2, %s48_s13  ;;  %32 = vrot.lane.b32.xlu1 %v31_v3, %s49_s14  ;;  %v24_v5 = vld [vmem:[#allocation1 + $0x2] ss:$8 sm:%s23_s12]   ;;  %14 = vst.msk [vmem:[#allocation0] sm:$0x3] %vm13_vm0, %v12_v4  }
   0xe   :  { %25 = vrot.lane.b32.xlu0 %v24_v5, %s50_s15 }
  0x7c   :  { %v19_v6 = vpop.permute.xlu0 %18   ;;  %v33_v7 = vpop.permute.xlu1 %32  }
  0x7d   :  { %21 = vst.msk [vmem:[#allocation0] sm:$0x3] %vm20_vm1, %v19_v6  }
  0x80   :  { %v26_v8 = vpop.permute.xlu0 %25  }
  0x81   :  { %28 = vst.msk [vmem:[#allocation0] sm:$0x3] %vm27_vm2, %v26_v8  }
  0x82   :  { %35 = vst.msk [vmem:[#allocation0] sm:$0x3] %vm34_vm3, %v33_v7  }
  0x89   :  { %v40_v9 = vld [vmem:[#allocation0] sm:$0x3] }
  0x8a   :  { %43 = vst [vmem:[%s71_s1] sm:$0x3] %v40_v9 }

// kernel: crossnet_forward.1
= control target key start
LH: loop header
LB: loop body
LE: loop exit
PB: predicated region body
PF: predicated region fallthrough
CT: control target
= control target key end

     0   :  { %v2724_v0 = vmov 0.0   ;;  %vm1980_vm0 = vmmov 0   ;;  %s2708_s3 = inlined_call_operand.vmem [shape: f32[128,128], index: 3, kind: input, shape index: {}]   ;;  %s2709_s0 = inlined_call_operand.vmem [shape: f32[4,128], index: 0, kind: input, shape index: {}]   ;;  %s2710_s1 = inlined_call_operand.vmem [shape: f32[2,128], index: 1, kind: input, shape index: {}]   ;;  %s2711_s2 = inlined_call_operand.vmem [shape: f32[2,128], index: 2, kind: input, shape index: {}]   ;;  %s2712_s4 = inlined_call_operand.vmem [shape: f32[4,128], index: 4, kind: output, shape index: {}]  }
   0x1   :  { %1557 = vmatprep.subr.mxu0 %v2724_v0  ;;  %v33_v1 = vld [vmem:[%s2708_s3 + $0x78] sm:$0xff]  ;;  %v32_v2 = vld [vmem:[%s2708_s3 + $0x70] sm:$0xff]  ;;  %v31_v3 = vld [vmem:[%s2708_s3 + $0x68] sm:$0xff]  ;;  %1592 = vmatprep.subr.mxu1 %v2724_v0 }
   0x2   :  { %v2017_v4 = vand.u32 4294901760, %v33_v1  ;;  %v2019_v5 = vand.u32 4294901760, %v32_v2  ;;  %v2021_v6 = vand.u32 4294901760, %v31_v3  ;;  %v30_v7 = vld [vmem:[%s2708_s3 + $0x60] sm:$0xff]  ;;  %v29_v8 = vld [vmem:[%s2708_s3 + $0x58] sm:$0xff]  ;;  %v28_v9 = vld [vmem:[%s2708_s3 + $0x50] sm:$0xff]  ;;  %1589 = vmatprep.mubr.msk.f32.mxu0 %vm1980_vm0, %v2724_v0  ;;  %1624 = vmatprep.mubr.msk.f32.mxu1 %vm1980_vm0, %v2724_v0 }
   0x3   :  { %v2036_v10 = vand.u32 4294901760, %v30_v7  ;;  %v2038_v11 = vand.u32 4294901760, %v29_v8  ;;  %v2040_v12 = vand.u32 4294901760, %v28_v9  ;;  %v27_v13 = vld [vmem:[%s2708_s3 + $0x48] sm:$0xff]  ;;  %v26_v14 = vld [vmem:[%s2708_s3 + $0x40] sm:$0xff]  ;;  %v25_v19 = vld [vmem:[%s2708_s3 + $0x38] sm:$0xff] }
   0x4   :  { %1558 = vmatpush3.msra.mxu0 %v2017_v4  ;;  %v2050_v15 = vsub.f32 %v33_v1, %v2017_v4  ;;  %v2053_v16 = vsub.f32 %v32_v2, %v2019_v5  ;;  %v2055_v17 = vand.u32 4294901760, %v27_v13  ;;  %v2058_v18 = vsub.f32 %v31_v3, %v2021_v6  ;;  %v24_v26 = vld [vmem:[%s2708_s3 + $0x30] sm:$0xff]  ;;  %v23_v34 = vld [vmem:[%s2708_s3 + $0x28] sm:$0xff]  ;;  %v22_v41 = vld [vmem:[%s2708_s3 + $0x20] sm:$0xff] }
   0x5   :  { %1559 = vmatprep.subr.mxu0 %v2724_v0  ;;  %v2065_v20 = vsub.f32 %v30_v7, %v2036_v10  ;;  %v2068_v21 = vsub.f32 %v29_v8, %v2038_v11  ;;  %v2080_v25 = vand.u32 4294901760, %v26_v14  ;;  %v2089_v28 = vand.u32 4294901760, %v25_v19  ;;  %v2147_v48 = vld [vmem:[%s2709_s0] sm:$0xf]  ;;  %v21_v51 = vld [vmem:[%s2708_s3 + $0x18] sm:$0xff]  ;;  %v20_v55 = vld [vmem:[%s2708_s3 + $0x10] sm:$0xff] }
   0x6   :  { %1560 = vmatpush3.msra.mxu0 %v2019_v5  ;;  %v2072_v22 = vand.u32 4294901760, %v2050_v15  ;;  %v2075_v23 = vand.u32 4294901760, %v2053_v16  ;;  %v2078_v24 = vand.u32 4294901760, %v2058_v18  ;;  %v2095_v30 = vsub.f32 %v28_v9, %v2040_v12  ;;  %2727 = vst [vmem:[#allocation2_spill] sm:$0xff] %v2147_v48  ;;  %v1349_v49 = vld [vmem:[%s2710_s1] ss:$0 sm:$0xff] }
   0x7   :  { %1561 = vmatprep.subr.mxu0 %v2724_v0  ;;  %v2087_v27 = vand.u32 4294901760, %v2065_v20  ;;  %v2092_v29 = vand.u32 4294901760, %v2068_v21  ;;  %v2108_v35 = vsub.f32 %v27_v13, %v2055_v17  ;;  %v2111_v36 = vand.u32 4294901760, %v24_v26  ;;  %v19_v62 = vld [vmem:[%s2708_s3 + $0x8] sm:$0xff]  ;;  %v18_v9 = vld [vmem:[%s2708_s3] sm:$0xff] }
   0x8   :  { %1562 = vmatpush3.msra.mxu0 %v2021_v6  ;;  %v136_v31 = vsub.f32 %v2050_v15, %v2072_v22  ;;  %v143_v32 = vsub.f32 %v2053_v16, %v2075_v23  ;;  %v150_v33 = vsub.f32 %v2058_v18, %v2078_v24  ;;  %v2121_v40 = vand.u32 4294901760, %v2095_v30 }
   0x9   :  { %1563 = vmatprep.subr.mxu0 %v2724_v0  ;;  %v157_v39 = vsub.f32 %v2065_v20, %v2087_v27  ;;  %v2127_v42 = vand.u32 4294901760, %v23_v34  ;;  %v2130_v43 = vsub.f32 %v26_v14, %v2080_v25  ;;  %v164_v45 = vsub.f32 %v2068_v21, %v2092_v29 }
   0xa   :  { %1564 = vmatpush3.msra.mxu0 %v2036_v10  ;;  %v2114_v37 = vand.u32 4294901760, %v136_v31  ;;  %v2116_v38 = vand.u32 4294901760, %v143_v32  ;;  %v2134_v44 = vand.u32 4294901760, %v150_v33  ;;  %v2139_v46 = vand.u32 4294901760, %v2108_v35 }
   0xb   :  { %1565 = vmatprep.subr.mxu0 %v2724_v0  ;;  %v2142_v47 = vsub.f32 %v25_v19, %v2089_v28  ;;  %v2154_v50 = vand.u32 4294901760, %v22_v41  ;;  %v2161_v52 = vand.u32 4294901760, %v157_v39  ;;  %v171_v53 = vsub.f32 %v2095_v30, %v2121_v40 }
   0xc   :  { %1566 = vmatpush3.msra.mxu0 %v2038_v11  ;;  %1593 = vmatpush3.msra.mxu1 %v2114_v37  ;;  %v2166_v54 = vand.u32 4294901760, %v2130_v43  ;;  %v2172_v56 = vsub.f32 %v24_v26, %v2111_v36  ;;  %v40_v58 = vmul.f32 %v1349_v49, %v2147_v48  ;;  %v2182_v59 = vand.u32 4294901760, %v164_v45 }
   0xd   :  { %1567 = vmatprep.subr.mxu0 %v2724_v0  ;;  %1594 = vmatprep.subr.mxu1 %v2724_v0  ;;  %2728 = vst [vmem:[#allocation3_spill] sm:$0xff] %v2161_v52  ;;  %v2177_v57 = vand.u32 4294901760, %v2142_v47  ;;  %v178_v60 = vsub.f32 %v2108_v35, %v2139_v46  ;;  %v2186_v61 = vand.u32 4294901760, %v21_v51  ;;  %v2192_v63 = vsub.f32 %v23_v34, %v2127_v42 }
   0xe   :  { %1568 = vmatpush3.msra.mxu0 %v2040_v12  ;;  %1595 = vmatpush3.msra.mxu1 %v2116_v38  ;;  %2729 = vst [vmem:[#allocation4_spill] sm:$0xff] %v2182_v59  ;;  %v2196_v1 = vand.u32 4294901760, %v20_v55  ;;  %v2198_v2 = vand.u32 4294901760, %v40_v58  ;;  %v2202_v3 = vand.u32 4294901760, %v171_v53  ;;  %v185_v7 = vsub.f32 %v2130_v43, %v2166_v54 }
   0xf   :  { %1569 = vmatprep.subr.mxu0 %v2724_v0  ;;  %1596 = vmatprep.subr.mxu1 %v2724_v0  ;;  %v2207_v8 = vand.u32 4294901760, %v2172_v56  ;;  %v2213_v13 = vsub.f32 %v22_v41, %v2154_v50  ;;  %v192_v14 = vsub.f32 %v2142_v47, %v2177_v57  ;;  %v2219_v19 = vand.u32 4294901760, %v19_v62 }
  0x10   :  { %1570 = vmatpush3.msra.mxu0 %v2055_v17  ;;  %1597 = vmatpush3.msra.mxu1 %v2134_v44  ;;  %2730 = vst [vmem:[#allocation5_spill] sm:$0xff] %v2202_v3  ;;  %v2223_v26 = vand.u32 4294901760, %v178_v60  ;;  %v2226_v31 = vand.u32 4294901760, %v2192_v63  ;;  %v2229_v32 = vsub.f32 %v40_v58, %v2198_v2  ;;  %v2232_v33 = vsub.f32 %v21_v51, %v2186_v61 }
  0x11   :  { %1571 = vmatprep.subr.mxu0 %v2724_v0  ;;  %1598 = vmatprep.subr.mxu1 %v2724_v0  ;;  %v2236_v34 = vand.u32 4294901760, %v18_v9  ;;  %v2240_v39 = vand.u32 4294901760, %v185_v7  ;;  %v199_v41 = vsub.f32 %v2172_v56, %v2207_v8  ;;  %v2245_v45 = vand.u32 4294901760, %v2213_v13 }
  0x12   :  { %1572 = vmatpush3.msra.mxu0 %v2080_v25  ;;  %1599 = vmatpush3.msra.mxu1 %v2161_v52  ;;  %2731 = vst [vmem:[#allocation6_spill] sm:$0xff] %v2223_v26  ;;  %v2248_v49 = vsub.f32 %v20_v55, %v2196_v1  ;;  %v2252_v51 = vand.u32 4294901760, %v192_v14  ;;  %v206_v53 = vsub.f32 %v2192_v63, %v2226_v31  ;;  %v2260_v60 = vand.u32 4294901760, %v2232_v33 }
  0x13   :  { %1573 = vmatprep.subr.mxu0 %v2724_v0  ;;  %1600 = vmatprep.subr.mxu1 %v2724_v0  ;;  %2732 = vst [vmem:[#allocation7_spill] sm:$0xff] %v2240_v39  ;;  %v2263_v55 = vsub.f32 %v19_v62, %v2219_v19  ;;  %v2269_v7 = vand.u32 4294901760, %v199_v41  ;;  %v213_v14 = vsub.f32 %v2213_v13, %v2245_v45  ;;  %v2736_v41 = vand.u32 4294901760, %v2229_v32 }
  0x14   :  { %1574 = vmatpush3.msra.mxu0 %v2089_v28  ;;  %1601 = vmatpush3.msra.mxu1 %v2182_v59  ;;  %2733 = vst [vmem:[#allocation8_spill] sm:$0xff] %v2252_v51  ;;  %v2274_v58 = vand.u32 4294901760, %v2248_v49  ;;  %v2277_v48 = vsub.f32 %v18_v9, %v2236_v34  ;;  %v2283_v62 = vand.u32 4294901760, %v206_v53 }
  0x15   :  { %1575 = vmatprep.subr.mxu0 %v2724_v0  ;;  %1602 = vmatprep.subr.mxu1 %v2724_v0  ;;  %2734 = vst [vmem:[#allocation9_spill] sm:$0xff] %v2269_v7  ;;  %v2291_v9 = vand.u32 4294901760, %v2263_v55  ;;  %v2297_v53 = vand.u32 4294901760, %v213_v14 }
  0x16   :  { %1576 = vmatpush3.msra.mxu0 %v2111_v36  ;;  %1603 = vmatpush3.msra.mxu1 %v2202_v3  ;;  %2735 = vst [vmem:[#allocation10_spill] sm:$0xff] %v2274_v58 }
  0x17   :  { %1577 = vmatprep.subr.mxu0 %v2724_v0  ;;  %1604 = vmatprep.subr.mxu1 %v2724_v0  ;;  %2737 = vst [vmem:[#allocation11_spill] sm:$0xff] %v2291_v9  ;;  %v234_v14 = vsub.f32 %v2263_v55, %v2291_v9 }
  0x18   :  { %1578 = vmatpush3.msra.mxu0 %v2127_v42  ;;  %1605 = vmatpush3.msra.mxu1 %v2223_v26  ;;  %v220_v26 = vsub.f32 %v2232_v33, %v2260_v60 }
  0x19   :  { %1579 = vmatprep.subr.mxu0 %v2724_v0  ;;  %1606 = vmatprep.subr.mxu1 %v2724_v0 }
  0x1a   :  { %1580 = vmatpush3.msra.mxu0 %v2154_v50  ;;  %1607 = vmatpush3.msra.mxu1 %v2240_v39  ;;  %v125_v39 = vsub.f32 %v2229_v32, %v2736_v41  ;;  %v2302_v41 = vand.u32 4294901760, %v2277_v48  ;;  %v2308_v59 = vand.u32 4294901760, %v220_v26  ;;  %v2323_v26 = vand.u32 4294901760, %v234_v14 }
  0x1b   :  { %1581 = vmatprep.subr.mxu0 %v2724_v0  ;;  %1608 = vmatprep.subr.mxu1 %v2724_v0 }
  0x1c   :  { %1582 = vmatpush3.msra.mxu0 %v2186_v61  ;;  %1609 = vmatpush3.msra.mxu1 %v2252_v51  ;;  %v227_v51 = vsub.f32 %v2248_v49, %v2274_v58  ;;  %2738 = vst [vmem:[#allocation12_spill] sm:$0xff] %v2302_v41  ;;  %v126_v3 = vand.u32 4294901760, %v125_v39  ;;  %v241_v52 = vsub.f32 %v2277_v48, %v2302_v41 }
  0x1d   :  { %1583 = vmatprep.subr.mxu0 %v2724_v0  ;;  %1610 = vmatprep.subr.mxu1 %v2724_v0 }
  0x1e   :  { %1584 = vmatpush3.msra.mxu0 %v2196_v1  ;;  %1611 = vmatpush3.msra.mxu1 %v2269_v7  ;;  %v2316_v7 = vand.u32 4294901760, %v227_v51  ;;  %v2329_v39 = vand.u32 4294901760, %v241_v52  ;;  %v2739_v52 = vand.u32 4294901760, %v2229_v32  ;;  %v2746_v51 = vld [vmem:[#allocation9_spill] sm:$0xff] }
  0x1f   :  { %1585 = vmatprep.subr.mxu0 %v2724_v0  ;;  %1612 = vmatprep.subr.mxu1 %v2724_v0 }
  0x20   :  { %1586 = vmatpush3.msra.mxu0 %v2219_v19  ;;  %1613 = vmatpush3.msra.mxu1 %v2283_v62 }
  0x21   :  { %1587 = vmatprep.subr.mxu0 %v2724_v0  ;;  %1614 = vmatprep.subr.mxu1 %v2724_v0 }
  0x22   :  { %1588 = vmatpush3.msra.mxu0 %v2236_v34  ;;  %1615 = vmatpush3.msra.mxu1 %v2297_v53 }
  0x23   :  { %1616 = vmatprep.subr.mxu1 %v2724_v0  ;;  %1627 = vmatprep.subr.mxu0 %v2724_v0 }
  0x24   :  { %1590 = vmatmul.mubr.f32.vlgmr.msra.gmra.mxu0 %v126_v3  ;;  %1617 = vmatpush3.msra.mxu1 %v2308_v59  ;;  %v2744_v3 = vld [vmem:[#allocation7_spill] sm:$0xff] }
  0x25   :  { %1628 = vmatpush3.msra.mxu0 %v2050_v15  ;;  %1618 = vmatprep.subr.mxu1 %v2724_v0 }
  0x26   :  { %1629 = vmatprep.subr.mxu0 %v2724_v0  ;;  %1619 = vmatpush3.msra.mxu1 %v2316_v7 }
  0x27   :  { %1630 = vmatpush3.msra.mxu0 %v2053_v16  ;;  %1620 = vmatprep.subr.mxu1 %v2724_v0 }
  0x28   :  { %1631 = vmatprep.subr.mxu0 %v2724_v0  ;;  %1621 = vmatpush3.msra.mxu1 %v2323_v26 }
  0x29   :  { %1632 = vmatpush3.msra.mxu0 %v2058_v18  ;;  %1622 = vmatprep.subr.mxu1 %v2724_v0 }
  0x2a   :  { %1633 = vmatprep.subr.mxu0 %v2724_v0  ;;  %1623 = vmatpush3.msra.mxu1 %v2329_v39 }
  0x2b   :  { %1634 = vmatpush3.msra.mxu0 %v2065_v20  ;;  %1625 = vmatmul.mubr.f32.vlgmr.msra.gmra.mxu1 %v2198_v2 }
  0x2c   :  { %1635 = vmatprep.subr.mxu0 %v2724_v0  ;;  %1662 = vmatprep.subr.mxu1 %v2724_v0 }
  0x2d   :  { %1636 = vmatpush3.msra.mxu0 %v2068_v21  ;;  %1663 = vmatpush3.msra.mxu1 %v2017_v4 }
  0x2e   :  { %1637 = vmatprep.subr.mxu0 %v2724_v0  ;;  %1664 = vmatprep.subr.mxu1 %v2724_v0 }
  0x2f   :  { %1638 = vmatpush3.msra.mxu0 %v2095_v30  ;;  %1665 = vmatpush3.msra.mxu1 %v2019_v5 }
  0x30   :  { %1639 = vmatprep.subr.mxu0 %v2724_v0  ;;  %1666 = vmatprep.subr.mxu1 %v2724_v0 }
  0x31   :  { %1640 = vmatpush3.msra.mxu0 %v2108_v35  ;;  %1667 = vmatpush3.msra.mxu1 %v2021_v6 }
  0x32   :  { %1641 = vmatprep.subr.mxu0 %v2724_v0  ;;  %1668 = vmatprep.subr.mxu1 %v2724_v0 }
  0x33   :  { %1642 = vmatpush3.msra.mxu0 %v2130_v43  ;;  %1669 = vmatpush3.msra.mxu1 %v2036_v10 }
  0x34   :  { %1643 = vmatprep.subr.mxu0 %v2724_v0  ;;  %1670 = vmatprep.subr.mxu1 %v2724_v0 }
  0x35   :  { %1644 = vmatpush3.msra.mxu0 %v2142_v47  ;;  %1671 = vmatpush3.msra.mxu1 %v2038_v11 }
  0x36   :  { %1645 = vmatprep.subr.mxu0 %v2724_v0  ;;  %1672 = vmatprep.subr.mxu1 %v2724_v0 }
  0x37   :  { %1646 = vmatpush3.msra.mxu0 %v2172_v56  ;;  %1673 = vmatpush3.msra.mxu1 %v2040_v12 }
  0x38   :  { %1647 = vmatprep.subr.mxu0 %v2724_v0  ;;  %1674 = vmatprep.subr.mxu1 %v2724_v0 }
  0x39   :  { %1648 = vmatpush3.msra.mxu0 %v2192_v63  ;;  %1675 = vmatpush3.msra.mxu1 %v2055_v17 }
  0x3a   :  { %1649 = vmatprep.subr.mxu0 %v2724_v0  ;;  %1676 = vmatprep.subr.mxu1 %v2724_v0 }
  0x3b   :  { %1650 = vmatpush3.msra.mxu0 %v2213_v13  ;;  %1677 = vmatpush3.msra.mxu1 %v2080_v25 }
  0x3c   :  { %1651 = vmatprep.subr.mxu0 %v2724_v0  ;;  %1678 = vmatprep.subr.mxu1 %v2724_v0 }
  0x3d   :  { %1652 = vmatpush3.msra.mxu0 %v2232_v33  ;;  %1679 = vmatpush3.msra.mxu1 %v2089_v28 }
  0x3e   :  { %1653 = vmatprep.subr.mxu0 %v2724_v0  ;;  %1680 = vmatprep.subr.mxu1 %v2724_v0 }
  0x3f   :  { %1654 = vmatpush3.msra.mxu0 %v2248_v49  ;;  %1681 = vmatpush3.msra.mxu1 %v2111_v36 }
  0x40   :  { %1655 = vmatprep.subr.mxu0 %v2724_v0  ;;  %1682 = vmatprep.subr.mxu1 %v2724_v0 }
  0x41   :  { %1656 = vmatpush3.msra.mxu0 %v2263_v55  ;;  %1683 = vmatpush3.msra.mxu1 %v2127_v42 }
  0x42   :  { %1657 = vmatprep.subr.mxu0 %v2724_v0  ;;  %1684 = vmatprep.subr.mxu1 %v2724_v0 }
  0x43   :  { %1658 = vmatpush3.msra.mxu0 %v2277_v48  ;;  %1659 = vmatprep.mubr.msk.f32.mxu0 %vm1980_vm0, %v2724_v0 }
  0x44   :  { %1685 = vmatpush3.msra.mxu1 %v2154_v50  ;;  %1660 = vmatmul.mubr.f32.vlgmr.msra.gmra.mxu0 %v2229_v32  ;;  %v2745_v32 = vld [vmem:[#allocation8_spill] sm:$0xff] }
  0x45   :  { %1686 = vmatprep.subr.mxu1 %v2724_v0  ;;  %1697 = vmatprep.subr.mxu0 %v2724_v0 }
  0x46   :  { %1687 = vmatpush3.msra.mxu1 %v2186_v61  ;;  %1698 = vmatpush3.msra.mxu0 %v2072_v22 }
  0x47   :  { %1688 = vmatprep.subr.mxu1 %v2724_v0  ;;  %1699 = vmatprep.subr.mxu0 %v2724_v0 }
  0x48   :  { %1689 = vmatpush3.msra.mxu1 %v2196_v1  ;;  %1700 = vmatpush3.msra.mxu0 %v2075_v23 }
  0x49   :  { %1690 = vmatprep.subr.mxu1 %v2724_v0  ;;  %1701 = vmatprep.subr.mxu0 %v2724_v0 }
  0x4a   :  { %1691 = vmatpush3.msra.mxu1 %v2219_v19  ;;  %1702 = vmatpush3.msra.mxu0 %v2078_v24 }
  0x4b   :  { %1692 = vmatprep.subr.mxu1 %v2724_v0  ;;  %1703 = vmatprep.subr.mxu0 %v2724_v0 }
  0x4c   :  { %1693 = vmatpush3.msra.mxu1 %v2236_v34  ;;  %1694 = vmatprep.mubr.msk.f32.mxu1 %vm1980_vm0, %v2724_v0 }
  0x4d   :  { %1704 = vmatpush3.msra.mxu0 %v2087_v27  ;;  %1695 = vmatmul.mubr.f32.vlgmr.msra.gmra.mxu1 %v2739_v52 }
  0x4e   :  { %1705 = vmatprep.subr.mxu0 %v2724_v0  ;;  %1732 = vmatprep.subr.mxu1 %v2724_v0 }
  0x4f   :  { %1706 = vmatpush3.msra.mxu0 %v2092_v29  ;;  %1733 = vmatpush3.msra.mxu1 %v2017_v4 }
  0x50   :  { %1707 = vmatprep.subr.mxu0 %v2724_v0  ;;  %1734 = vmatprep.subr.mxu1 %v2724_v0 }
  0x51   :  { %1708 = vmatpush3.msra.mxu0 %v2121_v40  ;;  %1735 = vmatpush3.msra.mxu1 %v2019_v5 }
  0x52   :  { %1709 = vmatprep.subr.mxu0 %v2724_v0  ;;  %1736 = vmatprep.subr.mxu1 %v2724_v0 }
  0x53   :  { %1710 = vmatpush3.msra.mxu0 %v2139_v46  ;;  %1737 = vmatpush3.msra.mxu1 %v2021_v6 }
  0x54   :  { %1711 = vmatprep.subr.mxu0 %v2724_v0  ;;  %1738 = vmatprep.subr.mxu1 %v2724_v0 }
  0x55   :  { %1712 = vmatpush3.msra.mxu0 %v2166_v54  ;;  %1739 = vmatpush3.msra.mxu1 %v2036_v10 }
  0x56   :  { %1713 = vmatprep.subr.mxu0 %v2724_v0  ;;  %1740 = vmatprep.subr.mxu1 %v2724_v0 }
  0x57   :  { %1714 = vmatpush3.msra.mxu0 %v2177_v57  ;;  %1741 = vmatpush3.msra.mxu1 %v2038_v11 }
  0x58   :  { %1715 = vmatprep.subr.mxu0 %v2724_v0  ;;  %1742 = vmatprep.subr.mxu1 %v2724_v0 }
  0x59   :  { %1716 = vmatpush3.msra.mxu0 %v2207_v8  ;;  %1743 = vmatpush3.msra.mxu1 %v2040_v12 }
  0x5a   :  { %1717 = vmatprep.subr.mxu0 %v2724_v0  ;;  %1744 = vmatprep.subr.mxu1 %v2724_v0 }
  0x5b   :  { %1718 = vmatpush3.msra.mxu0 %v2226_v31  ;;  %1745 = vmatpush3.msra.mxu1 %v2055_v17 }
  0x5c   :  { %1719 = vmatprep.subr.mxu0 %v2724_v0  ;;  %1746 = vmatprep.subr.mxu1 %v2724_v0 }
  0x5d   :  { %1720 = vmatpush3.msra.mxu0 %v2245_v45  ;;  %1747 = vmatpush3.msra.mxu1 %v2080_v25 }
  0x5e   :  { %1721 = vmatprep.subr.mxu0 %v2724_v0  ;;  %1748 = vmatprep.subr.mxu1 %v2724_v0 }
  0x5f   :  { %1722 = vmatpush3.msra.mxu0 %v2260_v60  ;;  %1749 = vmatpush3.msra.mxu1 %v2089_v28 }
  0x60   :  { %1723 = vmatprep.subr.mxu0 %v2724_v0  ;;  %1750 = vmatprep.subr.mxu1 %v2724_v0 }
  0x61   :  { %1724 = vmatpush3.msra.mxu0 %v2274_v58  ;;  %1751 = vmatpush3.msra.mxu1 %v2111_v36 }
  0x62   :  { %1725 = vmatprep.subr.mxu0 %v2724_v0  ;;  %1752 = vmatprep.subr.mxu1 %v2724_v0 }
  0x63   :  { %1726 = vmatpush3.msra.mxu0 %v2291_v9  ;;  %1753 = vmatpush3.msra.mxu1 %v2127_v42 }
  0x64   :  { %1727 = vmatprep.subr.mxu0 %v2724_v0  ;;  %1754 = vmatprep.subr.mxu1 %v2724_v0 }
  0x65   :  { %1728 = vmatpush3.msra.mxu0 %v2302_v41  ;;  %1729 = vmatprep.mubr.msk.f32.mxu0 %vm1980_vm0, %v2724_v0 }
  0x66   :  { %1755 = vmatpush3.msra.mxu1 %v2154_v50  ;;  %1730 = vmatmul.mubr.f32.vlgmr.msra.gmra.mxu0 %v2198_v2 }
  0x67   :  { %1756 = vmatprep.subr.mxu1 %v2724_v0  ;;  %1764 = vmatprep.mubr.msk.f32.mxu1 %vm1980_vm0, %v2724_v0 }
  0x68   :  { %1757 = vmatpush3.msra.mxu1 %v2186_v61  ;;  %1767 = vmatprep.subr.mxu0 %v2724_v0 }
  0x69   :  { %1758 = vmatprep.subr.mxu1 %v2724_v0  ;;  %1768 = vmatpush3.msra.mxu0 %v2017_v4 }
  0x6a   :  { %1759 = vmatpush3.msra.mxu1 %v2196_v1  ;;  %1769 = vmatprep.subr.mxu0 %v2724_v0 }
  0x6b   :  { %1760 = vmatprep.subr.mxu1 %v2724_v0  ;;  %1770 = vmatpush3.msra.mxu0 %v2019_v5 }
  0x6c   :  { %1761 = vmatpush3.msra.mxu1 %v2219_v19  ;;  %1771 = vmatprep.subr.mxu0 %v2724_v0 }
  0x6d   :  { %1762 = vmatprep.subr.mxu1 %v2724_v0  ;;  %1772 = vmatpush3.msra.mxu0 %v2021_v6 }
  0x6e   :  { %1763 = vmatpush3.msra.mxu1 %v2236_v34  ;;  %1773 = vmatprep.subr.mxu0 %v2724_v0 }
  0x6f   :  { %1765 = vmatmul.mubr.f32.vlgmr.msra.gmra.mxu1 %v2198_v2  ;;  %1802 = vmatprep.subr.mxu1 %v2724_v0  ;;  %v2743_v2 = vld [vmem:[#allocation6_spill] sm:$0xff] }
  0x70   :  { %1803 = vmatpush3.msra.mxu1 %v2114_v37  ;;  %1774 = vmatpush3.msra.mxu0 %v2036_v10  ;;  %v2740_v37 = vld [vmem:[#allocation3_spill] sm:$0xff] }
  0x71   :  { %1804 = vmatprep.subr.mxu1 %v2724_v0  ;;  %1775 = vmatprep.subr.mxu0 %v2724_v0 }
  0x72   :  { %1805 = vmatpush3.msra.mxu1 %v2116_v38  ;;  %1776 = vmatpush3.msra.mxu0 %v2038_v11  ;;  %v2741_v38 = vld [vmem:[#allocation4_spill] sm:$0xff] }
  0x73   :  { %1806 = vmatprep.subr.mxu1 %v2724_v0  ;;  %1777 = vmatprep.subr.mxu0 %v2724_v0 }
  0x74   :  { %1807 = vmatpush3.msra.mxu1 %v2134_v44  ;;  %1778 = vmatpush3.msra.mxu0 %v2040_v12  ;;  %v2742_v44 = vld [vmem:[#allocation5_spill] sm:$0xff] }
  0x75   :  { %1808 = vmatprep.subr.mxu1 %v2724_v0  ;;  %1779 = vmatprep.subr.mxu0 %v2724_v0 }
  0x76   :  { %1809 = vmatpush3.msra.mxu1 %v2740_v37  ;;  %1780 = vmatpush3.msra.mxu0 %v2055_v17 }
  0x77   :  { %1810 = vmatprep.subr.mxu1 %v2724_v0  ;;  %1781 = vmatprep.subr.mxu0 %v2724_v0 }
  0x78   :  { %1811 = vmatpush3.msra.mxu1 %v2741_v38  ;;  %1782 = vmatpush3.msra.mxu0 %v2080_v25 }
  0x79   :  { %1812 = vmatprep.subr.mxu1 %v2724_v0  ;;  %1783 = vmatprep.subr.mxu0 %v2724_v0 }
  0x7a   :  { %1813 = vmatpush3.msra.mxu1 %v2742_v44  ;;  %1784 = vmatpush3.msra.mxu0 %v2089_v28 }
  0x7b   :  { %1814 = vmatprep.subr.mxu1 %v2724_v0  ;;  %1785 = vmatprep.subr.mxu0 %v2724_v0 }
  0x7c   :  { %1815 = vmatpush3.msra.mxu1 %v2743_v2  ;;  %1786 = vmatpush3.msra.mxu0 %v2111_v36 }
  0x7d   :  { %1816 = vmatprep.subr.mxu1 %v2724_v0  ;;  %1787 = vmatprep.subr.mxu0 %v2724_v0 }
  0x7e   :  { %1817 = vmatpush3.msra.mxu1 %v2744_v3  ;;  %1788 = vmatpush3.msra.mxu0 %v2127_v42 }
  0x7f   :  { %1818 = vmatprep.subr.mxu1 %v2724_v0  ;;  %1789 = vmatprep.subr.mxu0 %v2724_v0 }
  0x80   :  { %1819 = vmatpush3.msra.mxu1 %v2745_v32  ;;  %1790 = vmatpush3.msra.mxu0 %v2154_v50 }
  0x81   :  { %1820 = vmatprep.subr.mxu1 %v2724_v0  ;;  %1791 = vmatprep.subr.mxu0 %v2724_v0 }
  0x82   :  { %1821 = vmatpush3.msra.mxu1 %v2746_v51  ;;  %1834 = vmatprep.mubr.msk.f32.mxu1 %vm1980_vm0, %v2724_v0 }
  0x83   :  { %1822 = vmatprep.subr.mxu1 %v2724_v0  ;;  %1792 = vmatpush3.msra.mxu0 %v2186_v61 }
  0x84   :  { %1823 = vmatpush3.msra.mxu1 %v2283_v62  ;;  %1793 = vmatprep.subr.mxu0 %v2724_v0 }
  0x85   :  { %1824 = vmatprep.subr.mxu1 %v2724_v0  ;;  %1794 = vmatpush3.msra.mxu0 %v2196_v1 }
  0x86   :  { %1825 = vmatpush3.msra.mxu1 %v2297_v53  ;;  %1795 = vmatprep.subr.mxu0 %v2724_v0 }
  0x87   :  { %1826 = vmatprep.subr.mxu1 %v2724_v0  ;;  %1796 = vmatpush3.msra.mxu0 %v2219_v19 }
  0x88   :  { %1827 = vmatpush3.msra.mxu1 %v2308_v59  ;;  %1797 = vmatprep.subr.mxu0 %v2724_v0 }
  0x89   :  { %1828 = vmatprep.subr.mxu1 %v2724_v0  ;;  %1798 = vmatpush3.msra.mxu0 %v2236_v34 }
  0x8a   :  { %1829 = vmatpush3.msra.mxu1 %v2316_v7  ;;  %1799 = vmatprep.mubr.msk.f32.mxu0 %vm1980_vm0, %v2724_v0 }
  0x8b   :  { %1830 = vmatprep.subr.mxu1 %v2724_v0  ;;  %1837 = vmatprep.subr.mxu0 %v2724_v0 }
  0x8c   :  { %1831 = vmatpush3.msra.mxu1 %v2323_v26 }
  0x8d   :  { %1832 = vmatprep.subr.mxu1 %v2724_v0 }
  0x8e   :  { %1833 = vmatpush3.msra.mxu1 %v2329_v39  ;;  %v1350_v39 = vld [vmem:[%s2711_s2] ss:$0 sm:$0xff] }
  0x8f   :  { %1872 = vmatprep.subr.mxu1 %v2724_v0 }
  0xe4   :  { %v128_v59 = vpop.f32.mrf.mxu0 }
  0xe6   :  { %v1591_v62 = vpop.f32.mrf.mxu0 }
  0xe7   :  { %v2747_v62 = vld [vmem:[#allocation2_spill] sm:$0xff] }
  0xeb   :  { %v279_v53 = vpop.f32.mrf.mxu1 }
  0xec   :  { %v280_v2 = vadd.f32 %v279_v53, %v128_v59 }
  0xed   :  { %v1626_v14 = vpop.f32.mrf.mxu1 }
 0x104   :  { %v383_v7 = vpop.f32.mrf.mxu0 }
 0x105   :  { %v384_v32 = vadd.f32 %v383_v7, %v280_v2 }
 0x106   :  { %v1661_v52 = vpop.f32.mrf.mxu0 }
 0x107   :  { %v1351_v52 = vld [vmem:[%s2710_s1 + $0x1] ss:$0 sm:$0xff] }
 0x10d   :  { %v472_v37 = vpop.f32.mrf.mxu1 }
 0x10e   :  { %v473_v51 = vadd.f32 %v472_v37, %v384_v32 }
 0x10f   :  { %v1696_v38 = vpop.f32.mrf.mxu1 }
 0x126   :  { %v591_v44 = vpop.f32.mrf.mxu0 }
 0x127   :  { %v592_v26 = vadd.f32 %v591_v44, %v473_v51 }
 0x128   :  { %v1731_v3 = vpop.f32.mrf.mxu0 }
 0x12f   :  { %v678_v41 = vpop.f32.mrf.mxu1 }
 0x130   :  { %v679_v9 = vadd.f32 %v678_v41, %v592_v26 }
 0x131   :  { %v1766_v0 = vpop.f32.mrf.mxu1 }
 0x132   :  { %v682_v58 = vmul.f32 %v679_v9, %v2747_v62  ;;  %v2748_v0 = vmov 0.0  }
 0x134   :  { %v687_v14 = vadd.f32 %v1350_v39, %v682_v58 }
 0x136   :  { %v2552_v59 = vadd.f32 %v687_v14, %v2747_v62 }
 0x138   :  { %v695_v53 = vmul.f32 %v1351_v52, %v2552_v59 }
 0x13a   :  { %v2555_v7 = vand.u32 4294901760, %v695_v53 }
 0x13c   :  { %1835 = vmatmul.mubr.f32.vlgmr.msra.gmra.mxu1 %v2555_v7  ;;  %v2559_v41 = vsub.f32 %v695_v53, %v2555_v7 }
 0x13d   :  { %1873 = vmatpush3.msra.mxu1 %v2017_v4  ;;  %1904 = vmatprep.mubr.msk.f32.mxu1 %vm1980_vm0, %v2748_v0 }
 0x13e   :  { %1874 = vmatprep.subr.mxu1 %v2748_v0  ;;  %v779_v58 = vand.u32 4294901760, %v2559_v41 }
 0x13f   :  { %1875 = vmatpush3.msra.mxu1 %v2019_v5 }
 0x140   :  { %1876 = vmatprep.subr.mxu1 %v2748_v0  ;;  %v780_v9 = vsub.f32 %v2559_v41, %v779_v58 }
 0x141   :  { %1877 = vmatpush3.msra.mxu1 %v2021_v6 }
 0x142   :  { %1878 = vmatprep.subr.mxu1 %v2748_v0  ;;  %v781_v37 = vand.u32 4294901760, %v780_v9 }
 0x143   :  { %1879 = vmatpush3.msra.mxu1 %v2036_v10 }
 0x144   :  { %1880 = vmatprep.subr.mxu1 %v2748_v0  ;;  %1800 = vmatmul.mubr.f32.vlgmr.msra.gmra.mxu0 %v781_v37 }
 0x145   :  { %1838 = vmatpush3.msra.mxu0 %v2050_v15  ;;  %1881 = vmatpush3.msra.mxu1 %v2038_v11 }
 0x146   :  { %1839 = vmatprep.subr.mxu0 %v2748_v0  ;;  %1882 = vmatprep.subr.mxu1 %v2748_v0 }
 0x147   :  { %1840 = vmatpush3.msra.mxu0 %v2053_v16  ;;  %1883 = vmatpush3.msra.mxu1 %v2040_v12 }
 0x148   :  { %1841 = vmatprep.subr.mxu0 %v2748_v0  ;;  %1884 = vmatprep.subr.mxu1 %v2748_v0 }
 0x149   :  { %1842 = vmatpush3.msra.mxu0 %v2058_v18  ;;  %1885 = vmatpush3.msra.mxu1 %v2055_v17 }
 0x14a   :  { %1843 = vmatprep.subr.mxu0 %v2748_v0  ;;  %1886 = vmatprep.subr.mxu1 %v2748_v0 }
 0x14b   :  { %1844 = vmatpush3.msra.mxu0 %v2065_v20  ;;  %1887 = vmatpush3.msra.mxu1 %v2080_v25 }
 0x14c   :  { %1845 = vmatprep.subr.mxu0 %v2748_v0  ;;  %1888 = vmatprep.subr.mxu1 %v2748_v0 }
 0x14d   :  { %1846 = vmatpush3.msra.mxu0 %v2068_v21  ;;  %1889 = vmatpush3.msra.mxu1 %v2089_v28 }
 0x14e   :  { %1847 = vmatprep.subr.mxu0 %v2748_v0  ;;  %1890 = vmatprep.subr.mxu1 %v2748_v0 }
 0x14f   :  { %1848 = vmatpush3.msra.mxu0 %v2095_v30  ;;  %1891 = vmatpush3.msra.mxu1 %v2111_v36 }
 0x150   :  { %1849 = vmatprep.subr.mxu0 %v2748_v0  ;;  %1892 = vmatprep.subr.mxu1 %v2748_v0 }
 0x151   :  { %1850 = vmatpush3.msra.mxu0 %v2108_v35  ;;  %1893 = vmatpush3.msra.mxu1 %v2127_v42  ;;  %v1352_v35 = vld [vmem:[%s2711_s2 + $0x1] ss:$0 sm:$0xff] }
 0x152   :  { %1851 = vmatprep.subr.mxu0 %v2748_v0  ;;  %1894 = vmatprep.subr.mxu1 %v2748_v0 }
 0x153   :  { %1852 = vmatpush3.msra.mxu0 %v2130_v43  ;;  %1895 = vmatpush3.msra.mxu1 %v2154_v50 }
 0x154   :  { %1853 = vmatprep.subr.mxu0 %v2748_v0  ;;  %1896 = vmatprep.subr.mxu1 %v2748_v0 }
 0x155   :  { %1854 = vmatpush3.msra.mxu0 %v2142_v47  ;;  %1897 = vmatpush3.msra.mxu1 %v2186_v61 }
 0x156   :  { %1855 = vmatprep.subr.mxu0 %v2748_v0  ;;  %1898 = vmatprep.subr.mxu1 %v2748_v0 }
 0x157   :  { %1856 = vmatpush3.msra.mxu0 %v2172_v56  ;;  %1899 = vmatpush3.msra.mxu1 %v2196_v1 }
 0x158   :  { %1857 = vmatprep.subr.mxu0 %v2748_v0  ;;  %1900 = vmatprep.subr.mxu1 %v2748_v0 }
 0x159   :  { %1858 = vmatpush3.msra.mxu0 %v2192_v63  ;;  %1901 = vmatpush3.msra.mxu1 %v2219_v19 }
 0x15a   :  { %1859 = vmatprep.subr.mxu0 %v2748_v0  ;;  %1902 = vmatprep.subr.mxu1 %v2748_v0 }
 0x15b   :  { %1860 = vmatpush3.msra.mxu0 %v2213_v13  ;;  %1903 = vmatpush3.msra.mxu1 %v2236_v34 }
 0x15c   :  { %1861 = vmatprep.subr.mxu0 %v2748_v0  ;;  %1905 = vmatmul.mubr.f32.vlgmr.msra.gmra.mxu1 %v779_v58 }
 0x15d   :  { %1942 = vmatprep.subr.mxu1 %v2748_v0  ;;  %1862 = vmatpush3.msra.mxu0 %v2232_v33 }
 0x15e   :  { %1943 = vmatpush3.msra.mxu1 %v2017_v4  ;;  %1863 = vmatprep.subr.mxu0 %v2748_v0  ;;  %v2749_v4 = vld [vmem:[#allocation10_spill] sm:$0xff] }
 0x15f   :  { %1944 = vmatprep.subr.mxu1 %v2748_v0  ;;  %1864 = vmatpush3.msra.mxu0 %v2248_v49 }
 0x160   :  { %1945 = vmatpush3.msra.mxu1 %v2019_v5  ;;  %1865 = vmatprep.subr.mxu0 %v2748_v0  ;;  %v2750_v5 = vld [vmem:[#allocation11_spill] sm:$0xff] }
 0x161   :  { %1946 = vmatprep.subr.mxu1 %v2748_v0  ;;  %1866 = vmatpush3.msra.mxu0 %v2263_v55 }
 0x162   :  { %1947 = vmatpush3.msra.mxu1 %v2021_v6  ;;  %1867 = vmatprep.subr.mxu0 %v2748_v0  ;;  %v2751_v6 = vld [vmem:[#allocation12_spill] sm:$0xff] }
 0x163   :  { %1948 = vmatprep.subr.mxu1 %v2748_v0  ;;  %1868 = vmatpush3.msra.mxu0 %v2277_v48 }
 0x164   :  { %1869 = vmatprep.mubr.msk.f32.mxu0 %vm1980_vm0, %v2748_v0  ;;  %1949 = vmatpush3.msra.mxu1 %v2036_v10 }
 0x165   :  { %1870 = vmatmul.mubr.f32.vlgmr.msra.gmra.mxu0 %v2559_v41  ;;  %1907 = vmatprep.subr.mxu0 %v2748_v0 }
 0x166   :  { %1950 = vmatprep.subr.mxu1 %v2748_v0  ;;  %1908 = vmatpush3.msra.mxu0 %v2072_v22 }
 0x167   :  { %1951 = vmatpush3.msra.mxu1 %v2038_v11  ;;  %1909 = vmatprep.subr.mxu0 %v2748_v0 }
 0x168   :  { %1952 = vmatprep.subr.mxu1 %v2748_v0  ;;  %1910 = vmatpush3.msra.mxu0 %v2075_v23 }
 0x169   :  { %1953 = vmatpush3.msra.mxu1 %v2040_v12  ;;  %1911 = vmatprep.subr.mxu0 %v2748_v0 }
 0x16a   :  { %1954 = vmatprep.subr.mxu1 %v2748_v0  ;;  %1912 = vmatpush3.msra.mxu0 %v2078_v24 }
 0x16b   :  { %1955 = vmatpush3.msra.mxu1 %v2055_v17  ;;  %1913 = vmatprep.subr.mxu0 %v2748_v0 }
 0x16c   :  { %1956 = vmatprep.subr.mxu1 %v2748_v0  ;;  %1914 = vmatpush3.msra.mxu0 %v2087_v27 }
 0x16d   :  { %1957 = vmatpush3.msra.mxu1 %v2080_v25  ;;  %1915 = vmatprep.subr.mxu0 %v2748_v0 }
 0x16e   :  { %1958 = vmatprep.subr.mxu1 %v2748_v0  ;;  %1916 = vmatpush3.msra.mxu0 %v2092_v29 }
 0x16f   :  { %1959 = vmatpush3.msra.mxu1 %v2089_v28  ;;  %1917 = vmatprep.subr.mxu0 %v2748_v0 }
 0x170   :  { %1960 = vmatprep.subr.mxu1 %v2748_v0  ;;  %1918 = vmatpush3.msra.mxu0 %v2121_v40 }
 0x171   :  { %1961 = vmatpush3.msra.mxu1 %v2111_v36  ;;  %1919 = vmatprep.subr.mxu0 %v2748_v0 }
 0x172   :  { %1962 = vmatprep.subr.mxu1 %v2748_v0  ;;  %1920 = vmatpush3.msra.mxu0 %v2139_v46 }
 0x173   :  { %1963 = vmatpush3.msra.mxu1 %v2127_v42  ;;  %1921 = vmatprep.subr.mxu0 %v2748_v0 }
 0x174   :  { %1964 = vmatprep.subr.mxu1 %v2748_v0  ;;  %1922 = vmatpush3.msra.mxu0 %v2166_v54 }
 0x175   :  { %1965 = vmatpush3.msra.mxu1 %v2154_v50  ;;  %1923 = vmatprep.subr.mxu0 %v2748_v0 }
 0x176   :  { %1966 = vmatprep.subr.mxu1 %v2748_v0  ;;  %1924 = vmatpush3.msra.mxu0 %v2177_v57 }
 0x177   :  { %1967 = vmatpush3.msra.mxu1 %v2186_v61  ;;  %1925 = vmatprep.subr.mxu0 %v2748_v0 }
 0x178   :  { %1968 = vmatprep.subr.mxu1 %v2748_v0  ;;  %1926 = vmatpush3.msra.mxu0 %v2207_v8 }
 0x179   :  { %1969 = vmatpush3.msra.mxu1 %v2196_v1  ;;  %1927 = vmatprep.subr.mxu0 %v2748_v0 }
 0x17a   :  { %1970 = vmatprep.subr.mxu1 %v2748_v0  ;;  %1928 = vmatpush3.msra.mxu0 %v2226_v31 }
 0x17b   :  { %1971 = vmatpush3.msra.mxu1 %v2219_v19  ;;  %1929 = vmatprep.subr.mxu0 %v2748_v0 }
 0x17c   :  { %1972 = vmatprep.subr.mxu1 %v2748_v0  ;;  %1930 = vmatpush3.msra.mxu0 %v2245_v45 }
 0x17d   :  { %1973 = vmatpush3.msra.mxu1 %v2236_v34  ;;  %1974 = vmatprep.mubr.msk.f32.mxu1 %vm1980_vm0, %v2748_v0 }
 0x17e   :  { %1931 = vmatprep.subr.mxu0 %v2748_v0  ;;  %1975 = vmatmul.mubr.f32.vlgmr.msra.gmra.mxu1 %v2555_v7 }
 0x17f   :  { %1932 = vmatpush3.msra.mxu0 %v2260_v60  ;;  %1939 = vmatprep.mubr.msk.f32.mxu0 %vm1980_vm0, %v2748_v0 }
 0x180   :  { %1933 = vmatprep.subr.mxu0 %v2748_v0 }
 0x181   :  { %1934 = vmatpush3.msra.mxu0 %v2749_v4 }
 0x182   :  { %1935 = vmatprep.subr.mxu0 %v2748_v0 }
 0x183   :  { %1936 = vmatpush3.msra.mxu0 %v2750_v5 }
 0x184   :  { %1937 = vmatprep.subr.mxu0 %v2748_v0 }
 0x185   :  { %1938 = vmatpush3.msra.mxu0 %v2751_v6 }
 0x186   :  { %1940 = vmatmul.mubr.f32.vlgmr.msra.gmra.mxu0 %v2555_v7 }
 0x1fc   :  { %v934_v10 = vpop.f32.mrf.mxu1 }
 0x1fe   :  { %v1836_v11 = vpop.f32.mrf.mxu1 }
 0x204   :  { %v783_v12 = vpop.f32.mrf.mxu0 }
 0x205   :  { %v935_v22 = vadd.f32 %v934_v10, %v783_v12 }
 0x206   :  { %v1801_v15 = vpop.f32.mrf.mxu0 }
 0x21c   :  { %v1127_v16 = vpop.f32.mrf.mxu1 }
 0x21e   :  { %v1906_v17 = vpop.f32.mrf.mxu1 }
 0x225   :  { %v1038_v18 = vpop.f32.mrf.mxu0 }
 0x226   :  { %v1039_v24 = vadd.f32 %v1038_v18, %v935_v22 }
 0x227   :  { %v1871_v20 = vpop.f32.mrf.mxu0 }
 0x228   :  { %v1128_v25 = vadd.f32 %v1127_v16, %v1039_v24 }
 0x23e   :  { %v1333_v21 = vpop.f32.mrf.mxu1 }
 0x240   :  { %v1976_v23 = vpop.f32.mrf.mxu1 }
 0x246   :  { %v1246_v27 = vpop.f32.mrf.mxu0 }
 0x247   :  { %v1247_v28 = vadd.f32 %v1246_v27, %v1128_v25 }
 0x248   :  { %v1941_v29 = vpop.f32.mrf.mxu0 }
 0x249   :  { %v1334_v30 = vadd.f32 %v1333_v21, %v1247_v28 }
 0x24b   :  { %v1337_v36 = vmul.f32 %v1334_v30, %v2747_v62 }
 0x24d   :  { %v1342_v40 = vadd.f32 %v1352_v35, %v1337_v36 }
 0x24f   :  { %v1343_v42 = vadd.f32 %v1342_v40, %v2552_v59 }
 0x251   :  { %1344 = vst [vmem:[%s2712_s4] sm:$0xf] %v1343_v42 }

</bundles_post_ra>
